<compile_context>
chip_gen: v5e
topology: v5e:2x2
jax: 0.10.0
libtpu: 0.0.40
codegen_flags: <defaults>
</compile_context>

<pallas_src>
import jax
import jax.numpy as jnp
from jax import lax
from jax.experimental import pallas as pl
from jax.experimental.pallas import tpu as pltpu


def _round_up(x, m):
    return ((x + m - 1) // m) * m


def _fused_gather_kernel(idx_ref, table_ref, out_ref):
    """Block-diagonal one-hot gather of all fields' normalized rows.

    idx_ref:   (bpad, nf)            int32   label per (batch row, field)
    table_ref: (nf*ncpad, total_pad) float32 packed normalized tables
    out_ref:   (bpad, total_pad)     float32 lane-dense output slab
    """
    idx = idx_ref[...]                    # (bpad, nf)
    table = table_ref[...]                # (K, total_pad)
    bpad, nf = idx.shape
    k = table.shape[0]
    ncpad = k // nf

    # Build the summed block-diagonal one-hot: onehot[b, f*ncpad + idx[b, f]] = 1.
    # nf is tiny & static -> unrolled VPU compare+add, one (bpad, K) vreg tile.
    iota_k = lax.broadcasted_iota(jnp.int32, (bpad, k), 1)
    onehot = jnp.zeros((bpad, k), jnp.float32)
    for f in range(nf):
        rows_f = idx[:, f:f + 1] + f * ncpad          # (bpad, 1)
        onehot = onehot + (iota_k == rows_f).astype(jnp.float32)

    # Single MXU dot gathers mean- and std-codes for every field at once.
    # Field f's table rows are zero outside its own column block, so the sum
    # over fields never mixes columns.
    out_ref[...] = jnp.dot(onehot, table, preferred_element_type=jnp.float32)


def fused_label_embed(x, table, *, num_fields):
    """x: (batch, num_fields) int32 -> (batch, total_pad) f32 output slab."""
    batch = x.shape[0]
    bpad = _round_up(max(batch, 8), 8)
    total_pad = table.shape[1]

    idx_p = jnp.zeros((bpad, num_fields), jnp.int32).at[:batch].set(
        x.astype(jnp.int32))

    slab = pl.pallas_call(
        _fused_gather_kernel,
        out_shape=jax.ShapeDtypeStruct((bpad, total_pad), jnp.float32),
        in_specs=[
            pl.BlockSpec(memory_space=pltpu.MemorySpace.VMEM),
            pl.BlockSpec(memory_space=pltpu.MemorySpace.VMEM),
        ],
        out_specs=pl.BlockSpec(memory_space=pltpu.MemorySpace.VMEM),
    )(idx_p, table)
    return slab[:batch]


class MultiLabelEmbedderPallas:
    """Mirrors MultiLabelEmbedder.forward: list of (norm_mean, norm_std) per field."""

    def __init__(self, nclass, code_size, key):
        self.nclass = list(nclass)
        self.code_size = list(code_size)
        self.nf = len(nclass)
        self.params = []
        for i, (nc, cs) in enumerate(zip(self.nclass, self.code_size)):
            k1, k2, k3, key = jax.random.split(key, 4)
            # Deterministic synthetic params (PyTorch init is zeros; use small
            # random values so the math path is actually exercised).
            mean = 0.5 * jax.random.normal(k1, (nc, cs), dtype=jnp.float32)
            lstd = 0.1 * jax.random.normal(k2, (nc, cs), dtype=jnp.float32)
            freq = jax.nn.softmax(jax.random.normal(k3, (nc,), dtype=jnp.float32))
            self.params.append((freq, mean, lstd))
        self._build_table()

    def _build_table(self):
        # Hoisted (plain JAX, runs once): class-frequency stats and the
        # normalization depend only on parameters, not on the input labels.
        self.ncpad = _round_up(max(self.nclass), 8)
        self.offsets = []
        off = 0
        for cs in self.code_size:
            self.offsets.append(off)
            off += 2 * cs
        self.total = off
        self.total_pad = _round_up(max(self.total, 128), 128)

        table = jnp.zeros((self.nf * self.ncpad, self.total_pad), jnp.float32)
        for f, (freq, mean, lstd) in enumerate(self.params):
            nc, cs = mean.shape
            full_mean = freq @ mean                                   # (cs,)
            full_var = freq @ (mean ** 2) - full_mean ** 2
            full_ev = freq @ (jnp.exp(lstd) ** 2)
            full_std = jnp.sqrt(jnp.maximum(full_var + full_ev, 1e-8))
            norm_mean = (mean - full_mean) / full_std                 # (nc, cs)
            norm_std = jnp.exp(lstd) / full_std                       # (nc, cs)
            r0 = f * self.ncpad
            c0 = self.offsets[f]
            table = table.at[r0:r0 + nc, c0:c0 + cs].set(norm_mean)
            table = table.at[r0:r0 + nc, c0 + cs:c0 + 2 * cs].set(norm_std)
        self.table = table

    def forward(self, x):
        # x: (batch, num_fields) int32 labels; field f consumes x[:, f] (== input.t()[f])
        slab = fused_label_embed(x, self.table, num_fields=self.nf)
        outs = []
        for f, cs in enumerate(self.code_size):
            c0 = self.offsets[f]
            outs.append((slab[:, c0:c0 + cs], slab[:, c0 + cs:c0 + 2 * cs]))
        return outs


def _reference_forward(x, params):
    """Pure-JAX reference matching the PyTorch LabelEmbedder.forward exactly."""
    outs = []
    for f, (freq, mean, lstd) in enumerate(params):
        idx = x[:, f]
        full_mean = freq @ mean
        full_var = freq @ (mean ** 2) - full_mean ** 2
        full_ev = freq @ (jnp.exp(lstd) ** 2)
        full_std = jnp.sqrt(jnp.maximum(full_var + full_ev, 1e-8))
        outs.append(((mean[idx] - full_mean) / full_std,
                     jnp.exp(lstd[idx]) / full_std))
    return outs


if __name__ == "__main__":
    key = jax.random.PRNGKey(0)
    nclass = [10, 7, 16]       # per-field number of classes
    code_size = [8, 4, 16]     # per-field embedding size
    batch = 8

    model = MultiLabelEmbedderPallas(nclass, code_size, key)

    kx, _ = jax.random.split(jax.random.PRNGKey(0))
    cols = [jax.random.randint(jax.random.fold_in(kx, i), (batch,), 0, nc)
            for i, nc in enumerate(nclass)]
    x = jnp.stack(cols, axis=1).astype(jnp.int32)   # (batch, num_fields)

    outs = model.forward(x)
    outs = jax.block_until_ready(outs)

    refs = _reference_forward(x, model.params)
    for (om, os_), (rm, rs) in zip(outs, refs):
        assert om.shape == rm.shape and os_.shape == rs.shape
        assert jnp.allclose(om, rm, atol=1e-5, rtol=1e-5)
        assert jnp.allclose(os_, rs, atol=1e-5, rtol=1e-5)

    print("KERNEL_OK")
</pallas_src>

<mosaic_0001>
module attributes {stable_mosaic.version = 11 : i64} {
  func.func @_fused_gather_kernel(%arg0: memref<8x3xi32, #tpu.memory_space<vmem>>, %arg1: memref<48x128xf32, #tpu.memory_space<vmem>>, %arg2: memref<8x128xf32, #tpu.memory_space<vmem>>) attributes {dimension_semantics = [], scalar_prefetch = 0 : i64, scratch_operands = 0 : i64, tpu.core_type = #tpu.core_type<tc>} {
    %c0 = arith.constant 0 : index
    %c0_0 = arith.constant 0 : index
    %0 = vector.load %arg0[%c0, %c0_0] : memref<8x3xi32, #tpu.memory_space<vmem>>, vector<8x3xi32>
    %c0_1 = arith.constant 0 : index
    %c0_2 = arith.constant 0 : index
    %1 = vector.load %arg1[%c0_1, %c0_2] : memref<48x128xf32, #tpu.memory_space<vmem>>, vector<48x128xf32>
    %2 = tpu.iota {dimensions = array<i32: 1>} : vector<8x48xi32>
    %cst = arith.constant 0.000000e+00 : f32
    %3 = vector.broadcast %cst : f32 to vector<8x48xf32>
    %4 = vector.extract_strided_slice %0 {offsets = [0, 0], sizes = [8, 1], strides = [1, 1]} : vector<8x3xi32> to vector<8x1xi32>
    %c0_i32 = arith.constant 0 : i32
    %5 = vector.broadcast %c0_i32 : i32 to vector<8x1xi32>
    %6 = arith.addi %4, %5 : vector<8x1xi32>
    %7 = vector.broadcast %6 : vector<8x1xi32> to vector<8x48xi32>
    %8 = arith.cmpi eq, %2, %7 : vector<8x48xi32>
    %9 = arith.extui %8 : vector<8x48xi1> to vector<8x48xi32>
    %10 = arith.sitofp %9 : vector<8x48xi32> to vector<8x48xf32>
    %11 = arith.addf %3, %10 : vector<8x48xf32>
    %12 = vector.extract_strided_slice %0 {offsets = [0, 1], sizes = [8, 1], strides = [1, 1]} : vector<8x3xi32> to vector<8x1xi32>
    %c16_i32 = arith.constant 16 : i32
    %13 = vector.broadcast %c16_i32 : i32 to vector<8x1xi32>
    %14 = arith.addi %12, %13 : vector<8x1xi32>
    %15 = vector.broadcast %14 : vector<8x1xi32> to vector<8x48xi32>
    %16 = arith.cmpi eq, %2, %15 : vector<8x48xi32>
    %17 = arith.extui %16 : vector<8x48xi1> to vector<8x48xi32>
    %18 = arith.sitofp %17 : vector<8x48xi32> to vector<8x48xf32>
    %19 = arith.addf %11, %18 : vector<8x48xf32>
    %20 = vector.extract_strided_slice %0 {offsets = [0, 2], sizes = [8, 1], strides = [1, 1]} : vector<8x3xi32> to vector<8x1xi32>
    %c32_i32 = arith.constant 32 : i32
    %21 = vector.broadcast %c32_i32 : i32 to vector<8x1xi32>
    %22 = arith.addi %20, %21 : vector<8x1xi32>
    %23 = vector.broadcast %22 : vector<8x1xi32> to vector<8x48xi32>
    %24 = arith.cmpi eq, %2, %23 : vector<8x48xi32>
    %25 = arith.extui %24 : vector<8x48xi1> to vector<8x48xi32>
    %26 = arith.sitofp %25 : vector<8x48xi32> to vector<8x48xf32>
    %27 = arith.addf %19, %26 : vector<8x48xf32>
    %cst_3 = arith.constant dense<0.000000e+00> : vector<8x128xf32>
    %28 = tpu.matmul %27, %1, %cst_3 {dimension_numbers = #tpu.dot_dimension_numbers<[1], [0], [0], [1], [0, 0, 1, 1], [], []>} : vector<8x48xf32>, vector<48x128xf32>, vector<8x128xf32> -> vector<8x128xf32>
    %c0_4 = arith.constant 0 : index
    %c0_5 = arith.constant 0 : index
    %29 = vector.load %arg2[%c0_4, %c0_5] : memref<8x128xf32, #tpu.memory_space<vmem>>, vector<8x128xf32>
    tpu.vector_store %arg2[%c0_4, %c0_5], %28 {strides = array<i32>} : memref<8x128xf32, #tpu.memory_space<vmem>>, vector<8x128xf32>,
    return
  }
}

</mosaic_0001>

<bundles_post_ra>
// kernel: tpu_custom_call.1
= control target key start
LH: loop header
LB: loop body
LE: loop exit
PB: predicated region body
PF: predicated region fallthrough
CT: control target
= control target key end

     0   :  { %7 = vsyncpa [#allocation3], 0  ;;  %s202_s0 = inlined_call_operand.vmem [shape: s32[8,3], index: 0, kind: input, shape index: {}]   ;;  %s203_s1 = inlined_call_operand.hbm [shape: f32[48,128], index: 1, kind: input, shape index: {}]   ;;  %s204_s2 = inlined_call_operand.hbm [shape: f32[8,128], index: 2, kind: output, shape index: {}]  }
   0x1   :  { %8 = vsyncpa [#allocation4], 0  ;;  %s15_s11 = sshll.u32 %s203_s1, 4  ;;  %s170_s12 = smov [#allocation2]   ;;  %s16_s11 = int_to_ptr.hbm [resolvable:$true] %s15_s11 }
   0x2   :  { %s17_s13 = sshll.u32 %s170_s12, 4  ;;  %s171_s14 = smov 128   ;;  %s18_s13 = int_to_ptr.vmem [resolvable:$true] %s17_s13 }
   0x3   :  { %s172_s15 = smov 8  }
   0x4   :  { %23 = dma.hbm_to_vmem [thread:$0]  %s16_s11, 768, %s18_s13, [#allocation3], %s171_s14, %s171_s14, %s172_s15  }
   0x5   :  { %166 = dma.done.wait [#allocation3], 768  }
   0x6   :  { %167 = vsyncadd [#allocation3], 4294966528  ;;  %v173_v0 = vmov 0   ;;  %v174_v1 = vmov 2   ;;  %v28_v2 = vld [vmem:[%s202_s0] sm:$0xff]  ;;  %v175_v5 = vmov 1   ;;  %v35_v12 = vlaneseq }
   0x7   :  { %114 = vset.pattern.permute.xlu0 %v173_v0  ;;  %116 = vset.pattern.permute.xlu1 %v174_v1  ;;  %v52_v3 = vadd.s32 32, %v28_v2  ;;  %v44_v4 = vadd.s32 16, %v28_v2  ;;  %v34_v6 = vld [vmem:[#allocation2 + $0x28] sm:$0xff]  ;;  %v33_v7 = vld [vmem:[#allocation2 + $0x20] sm:$0xff]  ;;  %v32_v8 = vld [vmem:[#allocation2 + $0x18] sm:$0xff]  ;;  %v176_v17 = vmov 0.0  }
   0x8   :  { %38 = vperm.xlu0 %114, %v28_v2   ;;  %74 = vmatpush.msra.mxu0 %v34_v6  ;;  %v31_v9 = vld [vmem:[#allocation2 + $0x10] sm:$0xff]  ;;  %v30_v10 = vld [vmem:[#allocation2 + $0x8] sm:$0xff]  ;;  %v29_v11 = vld [vmem:[#allocation2] sm:$0xff]  ;;  %v36_v14 = vand.u32 127, %v35_v12  ;;  %vm60_vm3 = vcmask 392192   ;;  %s177_s0 = smov [#allocation5]  }
   0x9   :  { %54 = vperm.xlu1 %116, %v52_v3   ;;  %s90_s1 = sshll.u32 %s177_s0, 4  ;;  %s92_s20 = sshll.u32 %s204_s2, 4  ;;  %s91_s1 = int_to_ptr.vmem [resolvable:$true] %s90_s1  ;;  %s93_s20 = int_to_ptr.hbm [resolvable:$true] %s92_s20 }
   0xa   :  { %75 = vmatpush.msra.mxu0 %v33_v7 }
   0xc   :  { %76 = vmatpush.msra.mxu0 %v32_v8 }
   0xe   :  { %77 = vmatpush.msra.mxu0 %v31_v9 }
  0x10   :  { %115 = vset.pattern.permute.xlu0 %v175_v5  ;;  %78 = vmatpush.msra.mxu0 %v30_v10 }
  0x11   :  { %46 = vperm.xlu0 %115, %v44_v4  }
  0x12   :  { %79 = vmatpush.msra.mxu0 %v29_v11 }
  0x19   :  { %117 = vset.pattern.permute.xlu0 %v174_v1 }
  0x7a   :  { %v39_v13 = vpop.permute.xlu0 %38 }
  0x7b   :  { %v55_v15 = vpop.permute.xlu1 %54  ;;  %vm40_vm0 = vcmp.eq.s32.totalorder %v36_v14, %v39_v13 }
  0x7c   :  { %vm56_vm1 = vcmp.eq.s32.totalorder %v36_v14, %v55_v15  ;;  %v102_v18 = vsel %vm40_vm0, 1.0, %v176_v17 }
  0x7d   :  { %v104_v20 = vsel %vm56_vm1, 1.0, %v176_v17 }
  0x83   :  { %v47_v16 = vpop.permute.xlu0 %46 }
  0x84   :  { %vm48_vm2 = vcmp.eq.s32.totalorder %v36_v14, %v47_v16 }
  0x85   :  { %v103_v19 = vsel %vm48_vm2, 1.0, %v176_v17 }
  0x86   :  { %v51_v21 = vadd.f32 %v103_v19, %v102_v18 }
  0x88   :  { %v59_v22 = vadd.f32 %v104_v20, %v51_v21 }
  0x8a   :  { %105 = vmatmul.msk.f32.vlgmr.msra.gmra.mxu0 %vm60_vm3, %v59_v22 }
 0x107   :  { %v81_v23 = vpop.f32.mrf.mxu0 }
 0x108   :  { %84 = vst [vmem:[#allocation5] sm:$0xff] %v81_v23 }
 0x109   :  { %95 = dma.vmem_to_hbm [thread:$0]  %s91_s1, 128, %s93_s20, [#allocation4]  }
 0x10a   :  { %168 = dma.done.wait [#allocation4], 128  }
 0x10b   :  { %169 = vsyncadd [#allocation4], 4294967168 }
 0x10c   :  { %100 = vsyncpa [#allocation3], 1 }
 0x10d   :  { %101 = vsyncpa [#allocation4], 1 }

</bundles_post_ra>
